<compile_context>
chip_gen: v7x
topology: tpu7x:2x2x1
jax: 0.10.0
libtpu: 0.0.40
codegen_flags: <defaults>
</compile_context>

<pallas_src>
import math

import jax
import jax.numpy as jnp
from jax import lax
from jax.experimental import pallas as pl
from jax.experimental.pallas import tpu as pltpu


# ----------------------------- fused Pallas kernel ----------------------------- #

def make_backbone_kernel(num_layers, T):
    """Builds the fused multi-layer kernel.

    Per grid step the refs are:
      x_ref                       : (rows, Cin)        f32  VMEM   (rows = batch_block * T)
      for each layer l            : w_ref_l (3, Cin_l, Cout_l) bf16,  b_ref_l (1, Cout_l) f32
      for each layer l (outputs)  : o_ref_l (rows, Cout_l)      f32
    """

    def kernel(*refs):
        x_ref = refs[0]
        wb_refs = refs[1:1 + 2 * num_layers]
        out_refs = refs[1 + 2 * num_layers:]

        act = x_ref[...]                            # (rows, Cin) f32 — batch folded into M
        rows = act.shape[0]

        # Boundary masks: computed once, reused by every layer.
        row = lax.broadcasted_iota(jnp.int32, (rows, 1), 0)
        tpos = row % T if rows > T else row         # within-batch time index (static branch)
        not_first = tpos != 0                       # zero the t-1 tap at t == 0     (per batch)
        not_last = tpos != (T - 1)                  # zero the t+1 tap at t == T-1   (per batch)

        for l in range(num_layers):
            w_ref = wb_refs[2 * l]                  # (3, Cin_l, Cout_l) bf16, tap-major
            b = wb_refs[2 * l + 1][...]             # (1, Cout_l) f32

            # Shifted copies of the activation (zero "same" padding at sequence ends).
            # Rolls wrap across the folded batch boundary but are masked to zero there.
            prev = jnp.where(not_first, pltpu.roll(act, shift=1, axis=0), 0.0)        # x[t-1]
            nxt = jnp.where(not_last, pltpu.roll(act, shift=rows - 1, axis=0), 0.0)   # x[t+1]

            # im2col along K realized as three per-tap dots that accumulate in f32 on the MXU:
            # the result IS the conv output — no (rows, 3*Cout) temporary, no column slices,
            # no f32 roll/select epilogue on Cout-wide data.
            y = jnp.dot(prev.astype(jnp.bfloat16), w_ref[0],
                        preferred_element_type=jnp.float32)
            y = y + jnp.dot(act.astype(jnp.bfloat16), w_ref[1],
                            preferred_element_type=jnp.float32)
            y = y + jnp.dot(nxt.astype(jnp.bfloat16), w_ref[2],
                            preferred_element_type=jnp.float32)

            y = y + b                               # bias broadcasts over rows (f32)
            y = jnp.where(y > 0, y, 0.2 * y)        # leaky_relu(0.2)

            out_refs[l][...] = y.astype(out_refs[l].dtype)   # (rows, Cout) — no reshape
            act = y                                 # stays on-chip (f32) for the next layer

    return kernel


# ------------------------------- wrapper / tiling ------------------------------- #

def _default_batch_block(B, T):
    """Split 2-way only on multi-TensorCore chips (v7x); v5e/v6e run one full-batch step,
    since their grid is a serial loop and splitting only adds per-step overhead."""
    try:
        kind = jax.devices()[0].device_kind.lower()
        multi_tc = ("v7" in kind) or ("7x" in kind)
    except Exception:  # pragma: no cover - conservative fallback
        multi_tc = False
    if multi_tc and B % 2 == 0 and ((B // 2) * T) % 8 == 0:
        return B // 2
    return B


def _vmem_limit_bytes(rows, cin, couts):
    """Explicit VMEM budget: double-buffered input/output blocks + weights + temporaries."""
    dims = [cin] + list(couts)
    io = rows * cin * 4 + sum(rows * c * 4 for c in couts)
    w = sum(3 * ci * co * 2 + co * 4 for ci, co in zip(dims[:-1], dims[1:]))
    tmp = 6 * rows * max(dims) * 4          # shifted copies, bf16 casts, accumulator slack
    est = 2 * (io + w) + tmp                # 2x: BlockSpec double-buffering
    return int(min(max(2 * est, 32 << 20), 64 << 20))   # clamp to v7x physical VMEM


def fused_backbone(x, params, *, batch_block=None):
    """x: (B, T, Cin) f32.  params: [(w (3, Cin, Cout) bf16, b (1, Cout) f32), ...].

    Returns a tuple of per-layer activations, each (B, T, Cout_l) f32.
    """
    B, T, cin = x.shape
    num_layers = len(params)
    couts = [int(w.shape[2]) for w, _ in params]
    assert int(params[0][0].shape[1]) == cin
    assert T % 8 == 0, "T must be a multiple of 8 so the folded rows stay sublane-aligned"

    if batch_block is None:
        batch_block = _default_batch_block(B, T)
    assert B % batch_block == 0
    assert (batch_block * T) % 8 == 0
    grid = (B // batch_block,)
    rows_blk = batch_block * T

    # Fold batch into the matmul M dimension outside the kernel (free reshape in HBM).
    x2d = x.reshape(B * T, cin)

    inputs = [x2d]
    in_specs = [pl.BlockSpec((rows_blk, cin), lambda i: (i, 0))]
    for w, b in params:
        inputs.append(w)
        inputs.append(b)
        in_specs.append(pl.BlockSpec(w.shape, lambda i: (0, 0, 0)))   # tiny, resident every step
        in_specs.append(pl.BlockSpec(b.shape, lambda i: (0, 0)))

    out_shape = tuple(jax.ShapeDtypeStruct((B * T, c), jnp.float32) for c in couts)
    out_specs = tuple(pl.BlockSpec((rows_blk, c), lambda i: (i, 0)) for c in couts)

    outs = pl.pallas_call(
        make_backbone_kernel(num_layers, T),
        out_shape=out_shape,
        grid=grid,
        in_specs=in_specs,
        out_specs=out_specs,
        compiler_params=pltpu.CompilerParams(
            dimension_semantics=("parallel",),
            vmem_limit_bytes=_vmem_limit_bytes(rows_blk, cin, couts),
        ),
    )(*inputs)

    # Reassemble the lane-folded 2-D outputs back to (B, T, Cout) for free outside the kernel.
    return tuple(o.reshape(B, T, c) for o, c in zip(outs, couts))


# ------------------------ Backbone (parameter setup) ---------------------- #

def init_backbone_params(key, input_dim, hidden_dim, output_dim, num_layers):
    """Deterministic kaiming_uniform_ weights (bias = 0), matching nn.Conv1d shapes.

    Weights are stored tap-major and in bf16: shape (3, Cin, Cout) where tap 0 multiplies
    x[t-1], tap 1 multiplies x[t], tap 2 multiplies x[t+1].
    """
    h = [hidden_dim] * (num_layers - 1)
    dims_in = [input_dim] + h
    dims_out = h + [output_dim]
    params = []
    for cin, cout in zip(dims_in, dims_out):
        key, sub = jax.random.split(key)
        fan_in = cin * 3
        bound = math.sqrt(6.0 / fan_in)                       # kaiming_uniform_ (a=0)
        w_torch = jax.random.uniform(sub, (cout, cin, 3), jnp.float32, -bound, bound)
        w_taps = jnp.transpose(w_torch, (2, 1, 0))            # (3, Cin, Cout), tap-major
        b = jnp.zeros((1, cout), jnp.float32)
        params.append((w_taps.astype(jnp.bfloat16), b))
    return params


def backbone_forward(tensors, mask, params):
    """tensors: (B, T, input_dim), mask: (B, T). Returns list of (features, mask)."""
    feats = fused_backbone(tensors, params)
    # NestedTensor bookkeeping: the mask is passed through unchanged alongside each feature.
    return [(f, mask) for f in feats]


# --------------------------------- main ----------------------------------- #

def _reference_layer(x, w, b):
    """Plain-JAX reference of one conv1d(k=3,pad=1)+leaky_relu layer (channels-last),
    using the same bf16 matmul operands / f32 accumulation as the kernel."""
    wf = w.astype(jnp.float32)                                # (3, Cin, Cout)
    xb = x.astype(jnp.bfloat16).astype(jnp.float32)
    prev = jnp.pad(xb[:, :-1], ((0, 0), (1, 0), (0, 0)))
    nxt = jnp.pad(xb[:, 1:], ((0, 0), (0, 1), (0, 0)))
    y = (jnp.einsum("btc,cd->btd", prev, wf[0])
         + jnp.einsum("btc,cd->btd", xb, wf[1])
         + jnp.einsum("btc,cd->btd", nxt, wf[2])
         + b[None])
    return jnp.where(y > 0, y, 0.2 * y)


if __name__ == "__main__":
    B, T = 2, 16
    input_dim, hidden_dim, output_dim, num_layers = 4, 32, 8, 3

    key = jax.random.PRNGKey(0)
    key, kx = jax.random.split(key)
    tensors = jax.random.normal(kx, (B, T, input_dim), jnp.float32)
    mask = jnp.zeros((B, T), jnp.bool_)

    params = init_backbone_params(key, input_dim, hidden_dim, output_dim, num_layers)

    outs = backbone_forward(tensors, mask, params)
    for feat, _ in outs:
        jax.block_until_ready(feat)

    # sanity check against a plain-JAX reference (tolerance relaxed for bf16 matmul operands)
    x_ref = tensors
    for (w, b), (feat, _) in zip(params, outs):
        x_ref = _reference_layer(x_ref, w, b)
        assert jnp.allclose(feat, x_ref, atol=3e-2, rtol=3e-2), "mismatch vs reference"

    assert outs[0][0].shape == (B, T, hidden_dim)
    assert outs[-1][0].shape == (B, T, output_dim)
    print("KERNEL_OK")
</pallas_src>

<mosaic_0001>
module attributes {stable_mosaic.version = 11 : i64} {
  func.func @kernel(%arg0: i32, %arg1: memref<32x4xf32, #tpu.memory_space<vmem>>, %arg2: memref<3x4x32xbf16, #tpu.memory_space<vmem>>, %arg3: memref<1x32xf32, #tpu.memory_space<vmem>>, %arg4: memref<3x32x32xbf16, #tpu.memory_space<vmem>>, %arg5: memref<1x32xf32, #tpu.memory_space<vmem>>, %arg6: memref<3x32x8xbf16, #tpu.memory_space<vmem>>, %arg7: memref<1x8xf32, #tpu.memory_space<vmem>>, %arg8: memref<32x32xf32, #tpu.memory_space<vmem>>, %arg9: memref<32x32xf32, #tpu.memory_space<vmem>>, %arg10: memref<32x8xf32, #tpu.memory_space<vmem>>) attributes {dimension_semantics = [#tpu.dimension_semantics<parallel>], iteration_bounds = array<i64: 1>, scalar_prefetch = 0 : i64, scratch_operands = 0 : i64, tpu.core_type = #tpu.core_type<tc>, window_params = [{transform_indices = @transform_0, window_bounds = array<i64: 32, 4>}, {pipeline_mode = #tpu.pipeline_mode<synchronous>, transform_indices = @transform_1, window_bounds = array<i64: 3, 4, 32>}, {pipeline_mode = #tpu.pipeline_mode<synchronous>, transform_indices = @transform_2, window_bounds = array<i64: 1, 32>}, {pipeline_mode = #tpu.pipeline_mode<synchronous>, transform_indices = @transform_3, window_bounds = array<i64: 3, 32, 32>}, {pipeline_mode = #tpu.pipeline_mode<synchronous>, transform_indices = @transform_4, window_bounds = array<i64: 1, 32>}, {pipeline_mode = #tpu.pipeline_mode<synchronous>, transform_indices = @transform_5, window_bounds = array<i64: 3, 32, 8>}, {pipeline_mode = #tpu.pipeline_mode<synchronous>, transform_indices = @transform_6, window_bounds = array<i64: 1, 8>}, {transform_indices = @transform_7, window_bounds = array<i64: 32, 32>}, {transform_indices = @transform_8, window_bounds = array<i64: 32, 32>}, {transform_indices = @transform_9, window_bounds = array<i64: 32, 8>}]} {
    %c0 = arith.constant 0 : index
    %c0_0 = arith.constant 0 : index
    %0 = vector.load %arg1[%c0, %c0_0] : memref<32x4xf32, #tpu.memory_space<vmem>>, vector<32x4xf32>
    %1 = tpu.iota {dimensions = array<i32: 0>} : vector<32x1xi32>
    %c16_i32 = arith.constant 16 : i32
    %c0_i32 = arith.constant 0 : i32
    %2 = arith.cmpi eq, %c16_i32, %c0_i32 : i32
    %c1_i32 = arith.constant 1 : i32
    %3 = arith.select %2, %c1_i32, %c16_i32 : i32
    %4 = vector.broadcast %3 : i32 to vector<32x1xi32>
    %5 = arith.remsi %1, %4 : vector<32x1xi32>
    %c0_i32_1 = arith.constant 0 : i32
    %6 = vector.broadcast %c0_i32_1 : i32 to vector<32x1xi32>
    %7 = arith.cmpi ne, %5, %6 : vector<32x1xi32>
    %c0_i32_2 = arith.constant 0 : i32
    %8 = vector.broadcast %c0_i32_2 : i32 to vector<32x1xi32>
    %9 = arith.cmpi slt, %5, %8 : vector<32x1xi32>
    %c0_i32_3 = arith.constant 0 : i32
    %10 = arith.cmpi slt, %3, %c0_i32_3 : i32
    %11 = vector.broadcast %10 : i1 to vector<32x1xi1>
    %12 = vector.broadcast %11 : vector<32x1xi1> to vector<32x1xi1>
    %13 = arith.xori %9, %12 : vector<32x1xi1>
    %14 = arith.andi %13, %7 : vector<32x1xi1>
    %15 = vector.broadcast %3 : i32 to vector<32x1xi32>
    %16 = arith.addi %5, %15 : vector<32x1xi32>
    %17 = arith.select %14, %16, %5 : vector<32x1xi1>, vector<32x1xi32>
    %c0_i32_4 = arith.constant 0 : i32
    %18 = vector.broadcast %c0_i32_4 : i32 to vector<32x1xi32>
    %19 = arith.cmpi ne, %17, %18 : vector<32x1xi32>
    %c15_i32 = arith.constant 15 : i32
    %20 = vector.broadcast %c15_i32 : i32 to vector<32x1xi32>
    %21 = arith.cmpi ne, %17, %20 : vector<32x1xi32>
    %c0_5 = arith.constant 0 : index
    %c0_6 = arith.constant 0 : index
    %22 = vector.load %arg3[%c0_5, %c0_6] : memref<1x32xf32, #tpu.memory_space<vmem>>, vector<1x32xf32>
    %c1_i32_7 = arith.constant 1 : i32
    %23 = tpu.dynamic_rotate %0 by %c1_i32_7 dim 0 : vector<32x4xf32>, i32 -> vector<32x4xf32>
    %cst = arith.constant 0.000000e+00 : f32
    %24 = vector.shape_cast %19 : vector<32x1xi1> to vector<32x1xi1>
    %25 = vector.broadcast %24 : vector<32x1xi1> to vector<32x4xi1>
    %26 = vector.broadcast %cst : f32 to vector<32x4xf32>
    %27 = arith.select %25, %23, %26 : vector<32x4xi1>, vector<32x4xf32>
    %c31_i32 = arith.constant 31 : i32
    %28 = tpu.dynamic_rotate %0 by %c31_i32 dim 0 : vector<32x4xf32>, i32 -> vector<32x4xf32>
    %cst_8 = arith.constant 0.000000e+00 : f32
    %29 = vector.shape_cast %21 : vector<32x1xi1> to vector<32x1xi1>
    %30 = vector.broadcast %29 : vector<32x1xi1> to vector<32x4xi1>
    %31 = vector.broadcast %cst_8 : f32 to vector<32x4xf32>
    %32 = arith.select %30, %28, %31 : vector<32x4xi1>, vector<32x4xf32>
    %33 = arith.truncf %27 : vector<32x4xf32> to vector<32x4xbf16>
    %c0_9 = arith.constant 0 : index
    %c0_10 = arith.constant 0 : index
    %c0_11 = arith.constant 0 : index
    %34 = vector.load %arg2[%c0_9, %c0_10, %c0_11] : memref<3x4x32xbf16, #tpu.memory_space<vmem>>, vector<1x4x32xbf16>
    %35 = vector.shape_cast %34 : vector<1x4x32xbf16> to vector<4x32xbf16>
    %cst_12 = arith.constant dense<0.000000e+00> : vector<32x32xf32>
    %36 = tpu.matmul %33, %35, %cst_12 {dimension_numbers = #tpu.dot_dimension_numbers<[1], [0], [0], [1], [0, 0, 1, 1], [], []>} : vector<32x4xbf16>, vector<4x32xbf16>, vector<32x32xf32> -> vector<32x32xf32>
    %37 = arith.truncf %0 : vector<32x4xf32> to vector<32x4xbf16>
    %c1 = arith.constant 1 : index
    %c0_13 = arith.constant 0 : index
    %c0_14 = arith.constant 0 : index
    %38 = vector.load %arg2[%c1, %c0_13, %c0_14] : memref<3x4x32xbf16, #tpu.memory_space<vmem>>, vector<1x4x32xbf16>
    %39 = vector.shape_cast %38 : vector<1x4x32xbf16> to vector<4x32xbf16>
    %cst_15 = arith.constant dense<0.000000e+00> : vector<32x32xf32>
    %40 = tpu.matmul %37, %39, %cst_15 {dimension_numbers = #tpu.dot_dimension_numbers<[1], [0], [0], [1], [0, 0, 1, 1], [], []>} : vector<32x4xbf16>, vector<4x32xbf16>, vector<32x32xf32> -> vector<32x32xf32>
    %41 = arith.addf %36, %40 : vector<32x32xf32>
    %42 = arith.truncf %32 : vector<32x4xf32> to vector<32x4xbf16>
    %c2 = arith.constant 2 : index
    %c0_16 = arith.constant 0 : index
    %c0_17 = arith.constant 0 : index
    %43 = vector.load %arg2[%c2, %c0_16, %c0_17] : memref<3x4x32xbf16, #tpu.memory_space<vmem>>, vector<1x4x32xbf16>
    %44 = vector.shape_cast %43 : vector<1x4x32xbf16> to vector<4x32xbf16>
    %cst_18 = arith.constant dense<0.000000e+00> : vector<32x32xf32>
    %45 = tpu.matmul %42, %44, %cst_18 {dimension_numbers = #tpu.dot_dimension_numbers<[1], [0], [0], [1], [0, 0, 1, 1], [], []>} : vector<32x4xbf16>, vector<4x32xbf16>, vector<32x32xf32> -> vector<32x32xf32>
    %46 = arith.addf %41, %45 : vector<32x32xf32>
    %47 = vector.broadcast %22 : vector<1x32xf32> to vector<32x32xf32>
    %48 = arith.addf %46, %47 : vector<32x32xf32>
    %cst_19 = arith.constant 0.000000e+00 : f32
    %49 = vector.broadcast %cst_19 : f32 to vector<32x32xf32>
    %50 = arith.cmpf ogt, %48, %49 : vector<32x32xf32>
    %cst_20 = arith.constant 2.000000e-01 : f32
    %51 = vector.broadcast %cst_20 : f32 to vector<32x32xf32>
    %52 = arith.mulf %51, %48 : vector<32x32xf32>
    %53 = arith.select %50, %48, %52 : vector<32x32xi1>, vector<32x32xf32>
    %c0_21 = arith.constant 0 : index
    %c0_22 = arith.constant 0 : index
    %54 = vector.load %arg8[%c0_21, %c0_22] : memref<32x32xf32, #tpu.memory_space<vmem>>, vector<32x32xf32>
    tpu.vector_store %arg8[%c0_21, %c0_22], %53 {strides = array<i32>} : memref<32x32xf32, #tpu.memory_space<vmem>>, vector<32x32xf32>,
    %c0_23 = arith.constant 0 : index
    %c0_24 = arith.constant 0 : index
    %55 = vector.load %arg5[%c0_23, %c0_24] : memref<1x32xf32, #tpu.memory_space<vmem>>, vector<1x32xf32>
    %c1_i32_25 = arith.constant 1 : i32
    %56 = tpu.dynamic_rotate %53 by %c1_i32_25 dim 0 : vector<32x32xf32>, i32 -> vector<32x32xf32>
    %cst_26 = arith.constant 0.000000e+00 : f32
    %57 = vector.shape_cast %19 : vector<32x1xi1> to vector<32x1xi1>
    %58 = vector.broadcast %57 : vector<32x1xi1> to vector<32x32xi1>
    %59 = vector.broadcast %cst_26 : f32 to vector<32x32xf32>
    %60 = arith.select %58, %56, %59 : vector<32x32xi1>, vector<32x32xf32>
    %c31_i32_27 = arith.constant 31 : i32
    %61 = tpu.dynamic_rotate %53 by %c31_i32_27 dim 0 : vector<32x32xf32>, i32 -> vector<32x32xf32>
    %cst_28 = arith.constant 0.000000e+00 : f32
    %62 = vector.shape_cast %21 : vector<32x1xi1> to vector<32x1xi1>
    %63 = vector.broadcast %62 : vector<32x1xi1> to vector<32x32xi1>
    %64 = vector.broadcast %cst_28 : f32 to vector<32x32xf32>
    %65 = arith.select %63, %61, %64 : vector<32x32xi1>, vector<32x32xf32>
    %66 = arith.truncf %60 : vector<32x32xf32> to vector<32x32xbf16>
    %c0_29 = arith.constant 0 : index
    %c0_30 = arith.constant 0 : index
    %c0_31 = arith.constant 0 : index
    %67 = vector.load %arg4[%c0_29, %c0_30, %c0_31] : memref<3x32x32xbf16, #tpu.memory_space<vmem>>, vector<1x32x32xbf16>
    %68 = vector.shape_cast %67 : vector<1x32x32xbf16> to vector<32x32xbf16>
    %cst_32 = arith.constant dense<0.000000e+00> : vector<32x32xf32>
    %69 = tpu.matmul %66, %68, %cst_32 {dimension_numbers = #tpu.dot_dimension_numbers<[1], [0], [0], [1], [0, 0, 1, 1], [], []>} : vector<32x32xbf16>, vector<32x32xbf16>, vector<32x32xf32> -> vector<32x32xf32>
    %70 = arith.truncf %53 : vector<32x32xf32> to vector<32x32xbf16>
    %c1_33 = arith.constant 1 : index
    %c0_34 = arith.constant 0 : index
    %c0_35 = arith.constant 0 : index
    %71 = vector.load %arg4[%c1_33, %c0_34, %c0_35] : memref<3x32x32xbf16, #tpu.memory_space<vmem>>, vector<1x32x32xbf16>
    %72 = vector.shape_cast %71 : vector<1x32x32xbf16> to vector<32x32xbf16>
    %cst_36 = arith.constant dense<0.000000e+00> : vector<32x32xf32>
    %73 = tpu.matmul %70, %72, %cst_36 {dimension_numbers = #tpu.dot_dimension_numbers<[1], [0], [0], [1], [0, 0, 1, 1], [], []>} : vector<32x32xbf16>, vector<32x32xbf16>, vector<32x32xf32> -> vector<32x32xf32>
    %74 = arith.addf %69, %73 : vector<32x32xf32>
    %75 = arith.truncf %65 : vector<32x32xf32> to vector<32x32xbf16>
    %c2_37 = arith.constant 2 : index
    %c0_38 = arith.constant 0 : index
    %c0_39 = arith.constant 0 : index
    %76 = vector.load %arg4[%c2_37, %c0_38, %c0_39] : memref<3x32x32xbf16, #tpu.memory_space<vmem>>, vector<1x32x32xbf16>
    %77 = vector.shape_cast %76 : vector<1x32x32xbf16> to vector<32x32xbf16>
    %cst_40 = arith.constant dense<0.000000e+00> : vector<32x32xf32>
    %78 = tpu.matmul %75, %77, %cst_40 {dimension_numbers = #tpu.dot_dimension_numbers<[1], [0], [0], [1], [0, 0, 1, 1], [], []>} : vector<32x32xbf16>, vector<32x32xbf16>, vector<32x32xf32> -> vector<32x32xf32>
    %79 = arith.addf %74, %78 : vector<32x32xf32>
    %80 = vector.broadcast %55 : vector<1x32xf32> to vector<32x32xf32>
    %81 = arith.addf %79, %80 : vector<32x32xf32>
    %cst_41 = arith.constant 0.000000e+00 : f32
    %82 = vector.broadcast %cst_41 : f32 to vector<32x32xf32>
    %83 = arith.cmpf ogt, %81, %82 : vector<32x32xf32>
    %cst_42 = arith.constant 2.000000e-01 : f32
    %84 = vector.broadcast %cst_42 : f32 to vector<32x32xf32>
    %85 = arith.mulf %84, %81 : vector<32x32xf32>
    %86 = arith.select %83, %81, %85 : vector<32x32xi1>, vector<32x32xf32>
    %c0_43 = arith.constant 0 : index
    %c0_44 = arith.constant 0 : index
    %87 = vector.load %arg9[%c0_43, %c0_44] : memref<32x32xf32, #tpu.memory_space<vmem>>, vector<32x32xf32>
    tpu.vector_store %arg9[%c0_43, %c0_44], %86 {strides = array<i32>} : memref<32x32xf32, #tpu.memory_space<vmem>>, vector<32x32xf32>,
    %c0_45 = arith.constant 0 : index
    %c0_46 = arith.constant 0 : index
    %88 = vector.load %arg7[%c0_45, %c0_46] : memref<1x8xf32, #tpu.memory_space<vmem>>, vector<1x8xf32>
    %c1_i32_47 = arith.constant 1 : i32
    %89 = tpu.dynamic_rotate %86 by %c1_i32_47 dim 0 : vector<32x32xf32>, i32 -> vector<32x32xf32>
    %cst_48 = arith.constant 0.000000e+00 : f32
    %90 = vector.shape_cast %19 : vector<32x1xi1> to vector<32x1xi1>
    %91 = vector.broadcast %90 : vector<32x1xi1> to vector<32x32xi1>
    %92 = vector.broadcast %cst_48 : f32 to vector<32x32xf32>
    %93 = arith.select %91, %89, %92 : vector<32x32xi1>, vector<32x32xf32>
    %c31_i32_49 = arith.constant 31 : i32
    %94 = tpu.dynamic_rotate %86 by %c31_i32_49 dim 0 : vector<32x32xf32>, i32 -> vector<32x32xf32>
    %cst_50 = arith.constant 0.000000e+00 : f32
    %95 = vector.shape_cast %21 : vector<32x1xi1> to vector<32x1xi1>
    %96 = vector.broadcast %95 : vector<32x1xi1> to vector<32x32xi1>
    %97 = vector.broadcast %cst_50 : f32 to vector<32x32xf32>
    %98 = arith.select %96, %94, %97 : vector<32x32xi1>, vector<32x32xf32>
    %99 = arith.truncf %93 : vector<32x32xf32> to vector<32x32xbf16>
    %c0_51 = arith.constant 0 : index
    %c0_52 = arith.constant 0 : index
    %c0_53 = arith.constant 0 : index
    %100 = vector.load %arg6[%c0_51, %c0_52, %c0_53] : memref<3x32x8xbf16, #tpu.memory_space<vmem>>, vector<1x32x8xbf16>
    %101 = vector.shape_cast %100 : vector<1x32x8xbf16> to vector<32x8xbf16>
    %cst_54 = arith.constant dense<0.000000e+00> : vector<32x8xf32>
    %102 = tpu.matmul %99, %101, %cst_54 {dimension_numbers = #tpu.dot_dimension_numbers<[1], [0], [0], [1], [0, 0, 1, 1], [], []>} : vector<32x32xbf16>, vector<32x8xbf16>, vector<32x8xf32> -> vector<32x8xf32>
    %103 = arith.truncf %86 : vector<32x32xf32> to vector<32x32xbf16>
    %c1_55 = arith.constant 1 : index
    %c0_56 = arith.constant 0 : index
    %c0_57 = arith.constant 0 : index
    %104 = vector.load %arg6[%c1_55, %c0_56, %c0_57] : memref<3x32x8xbf16, #tpu.memory_space<vmem>>, vector<1x32x8xbf16>
    %105 = vector.shape_cast %104 : vector<1x32x8xbf16> to vector<32x8xbf16>
    %cst_58 = arith.constant dense<0.000000e+00> : vector<32x8xf32>
    %106 = tpu.matmul %103, %105, %cst_58 {dimension_numbers = #tpu.dot_dimension_numbers<[1], [0], [0], [1], [0, 0, 1, 1], [], []>} : vector<32x32xbf16>, vector<32x8xbf16>, vector<32x8xf32> -> vector<32x8xf32>
    %107 = arith.addf %102, %106 : vector<32x8xf32>
    %108 = arith.truncf %98 : vector<32x32xf32> to vector<32x32xbf16>
    %c2_59 = arith.constant 2 : index
    %c0_60 = arith.constant 0 : index
    %c0_61 = arith.constant 0 : index
    %109 = vector.load %arg6[%c2_59, %c0_60, %c0_61] : memref<3x32x8xbf16, #tpu.memory_space<vmem>>, vector<1x32x8xbf16>
    %110 = vector.shape_cast %109 : vector<1x32x8xbf16> to vector<32x8xbf16>
    %cst_62 = arith.constant dense<0.000000e+00> : vector<32x8xf32>
    %111 = tpu.matmul %108, %110, %cst_62 {dimension_numbers = #tpu.dot_dimension_numbers<[1], [0], [0], [1], [0, 0, 1, 1], [], []>} : vector<32x32xbf16>, vector<32x8xbf16>, vector<32x8xf32> -> vector<32x8xf32>
    %112 = arith.addf %107, %111 : vector<32x8xf32>
    %113 = vector.broadcast %88 : vector<1x8xf32> to vector<32x8xf32>
    %114 = arith.addf %112, %113 : vector<32x8xf32>
    %cst_63 = arith.constant 0.000000e+00 : f32
    %115 = vector.broadcast %cst_63 : f32 to vector<32x8xf32>
    %116 = arith.cmpf ogt, %114, %115 : vector<32x8xf32>
    %cst_64 = arith.constant 2.000000e-01 : f32
    %117 = vector.broadcast %cst_64 : f32 to vector<32x8xf32>
    %118 = arith.mulf %117, %114 : vector<32x8xf32>
    %119 = arith.select %116, %114, %118 : vector<32x8xi1>, vector<32x8xf32>
    %c0_65 = arith.constant 0 : index
    %c0_66 = arith.constant 0 : index
    %120 = vector.load %arg10[%c0_65, %c0_66] : memref<32x8xf32, #tpu.memory_space<vmem>>, vector<32x8xf32>
    tpu.vector_store %arg10[%c0_65, %c0_66], %119 {strides = array<i32>} : memref<32x8xf32, #tpu.memory_space<vmem>>, vector<32x8xf32>,
    return
  }
  func.func @transform_0(%arg0: i32) -> (i32, i32) {
    %c0_i32 = arith.constant 0 : i32
    %c0_i32_0 = arith.constant 0 : i32
    return %arg0, %c0_i32 : i32, i32
  }
  func.func @transform_1(%arg0: i32) -> (i32, i32, i32) {
    %c0_i32 = arith.constant 0 : i32
    %c0_i32_0 = arith.constant 0 : i32
    %c0_i32_1 = arith.constant 0 : i32
    %c0_i32_2 = arith.constant 0 : i32
    return %c0_i32, %c0_i32_0, %c0_i32_1 : i32, i32, i32
  }
  func.func @transform_2(%arg0: i32) -> (i32, i32) {
    %c0_i32 = arith.constant 0 : i32
    %c0_i32_0 = arith.constant 0 : i32
    %c0_i32_1 = arith.constant 0 : i32
    return %c0_i32, %c0_i32_0 : i32, i32
  }
  func.func @transform_3(%arg0: i32) -> (i32, i32, i32) {
    %c0_i32 = arith.constant 0 : i32
    %c0_i32_0 = arith.constant 0 : i32
    %c0_i32_1 = arith.constant 0 : i32
    %c0_i32_2 = arith.constant 0 : i32
    return %c0_i32, %c0_i32_0, %c0_i32_1 : i32, i32, i32
  }
  func.func @transform_4(%arg0: i32) -> (i32, i32) {
    %c0_i32 = arith.constant 0 : i32
    %c0_i32_0 = arith.constant 0 : i32
    %c0_i32_1 = arith.constant 0 : i32
    return %c0_i32, %c0_i32_0 : i32, i32
  }
  func.func @transform_5(%arg0: i32) -> (i32, i32, i32) {
    %c0_i32 = arith.constant 0 : i32
    %c0_i32_0 = arith.constant 0 : i32
    %c0_i32_1 = arith.constant 0 : i32
    %c0_i32_2 = arith.constant 0 : i32
    return %c0_i32, %c0_i32_0, %c0_i32_1 : i32, i32, i32
  }
  func.func @transform_6(%arg0: i32) -> (i32, i32) {
    %c0_i32 = arith.constant 0 : i32
    %c0_i32_0 = arith.constant 0 : i32
    %c0_i32_1 = arith.constant 0 : i32
    return %c0_i32, %c0_i32_0 : i32, i32
  }
  func.func @transform_7(%arg0: i32) -> (i32, i32) {
    %c0_i32 = arith.constant 0 : i32
    %c0_i32_0 = arith.constant 0 : i32
    return %arg0, %c0_i32 : i32, i32
  }
  func.func @transform_8(%arg0: i32) -> (i32, i32) {
    %c0_i32 = arith.constant 0 : i32
    %c0_i32_0 = arith.constant 0 : i32
    return %arg0, %c0_i32 : i32, i32
  }
  func.func @transform_9(%arg0: i32) -> (i32, i32) {
    %c0_i32 = arith.constant 0 : i32
    %c0_i32_0 = arith.constant 0 : i32
    return %arg0, %c0_i32 : i32, i32
  }
}

</mosaic_0001>

<bundles_post_ra>
// kernel: tpu_custom_call.1
= control target key start
LH: loop header
LB: loop body
LE: loop exit
PB: predicated region body
PF: predicated region fallthrough
CT: control target
= control target key end

     0   :  { %15 = vsyncpa [#allocation3], 0  ;;  %vm154_vm0 = vcmask 1041408   ;;  %v36_v3 = vlaneseq  ;;  %vm147_vm1 = vcmask 31744   ;;  %s1483_s0 = inlined_call_operand.vmem [shape: f32[32,4], index: 0, kind: input, shape index: {}]   ;;  %s1484_s1 = inlined_call_operand.vmem [shape: bf16[3,4,32], index: 1, kind: input, shape index: {}]   ;;  %s1485_s2 = inlined_call_operand.vmem [shape: f32[1,32], index: 2, kind: input, shape index: {}]   ;;  %s1486_s3 = inlined_call_operand.vmem [shape: bf16[3,32,32], index: 3, kind: input, shape index: {}]   ;;  %s1487_s4 = inlined_call_operand.vmem [shape: f32[1,32], index: 4, kind: input, shape index: {}]   ;;  %s1488_s5 = inlined_call_operand.vmem [shape: bf16[3,32,8], index: 5, kind: input, shape index: {}]   ;;  %s1489_s6 = inlined_call_operand.vmem [shape: f32[1,8], index: 6, kind: input, shape index: {}]   ;;  %s1490_s7 = inlined_call_operand.hbm [shape: f32[32,32], index: 7, kind: output, shape index: {0}]   ;;  %s1491_s8 = inlined_call_operand.hbm [shape: f32[32,32], index: 8, kind: output, shape index: {1}]   ;;  %s1492_s9 = inlined_call_operand.vmem [shape: f32[32,8], index: 9, kind: output, shape index: {2}]  }
   0x1   :  { %v142_v0 = vld [vmem:[%s1484_s1] sm:$0x3]  ;;  %v33_v2 = vld [vmem:[%s1483_s0 + $0x8] sm:$0xff]  ;;  %v35_v5 = vld [vmem:[%s1483_s0 + $0x18] sm:$0xff] }
   0x2   :  { %v32_v1 = vld [vmem:[%s1483_s0] sm:$0xff]  ;;  %1122 = vmatprep.subr.msk.bf16.mxu0 %vm154_vm0, %v142_v0  ;;  %v214_v4 = vsel %vm154_vm0, %v142_v0, 0  ;;  %v99_v7 = vrot.slane %v33_v2, 7  ;;  %v34_v8 = vld [vmem:[%s1483_s0 + $0x10] sm:$0xff]  ;;  %v1259_v9 = vshrl.u32 %v36_v3, 7  ;;  %v101_v10 = vrot.slane %v35_v5, 7 }
   0x3   :  { %v98_v6 = vrot.slane %v32_v1, 7  ;;  %1038 = vmatpush3.bf16.msra.mxu0 %v214_v4  ;;  %v119_v11 = vrot.slane %v32_v1, 1  ;;  %v120_v12 = vrot.slane %v33_v2, 1  ;;  %v952_v13 = vld [vmem:[%s1484_s1 + $0x4] sm:$0x3]  ;;  %v122_v14 = vrot.slane %v35_v5, 1 }
   0x4   :  { %1123 = vmatprep.subr.msk.bf16.mxu0 %vm154_vm0, %v952_v13  ;;  %v100_v15 = vrot.slane %v34_v8, 7  ;;  %v947_v16 = vld [vmem:[%s1484_s1 + $0x2] sm:$0x3]  ;;  %v143_v17 = vpack.c.bf16 %v33_v2, %v32_v1  ;;  %v45_v18 = vand.u32 15, %v1259_v9  ;;  %vm102_vm2 = vcmp.lt.s32.totalorder %v1259_v9, 1 }
   0x5   :  { %vm123_vm3 = vcmp.lt.s32.totalorder %v1259_v9, 7  ;;  %v39_v19 = vadd.s32 16, %v1259_v9  ;;  %1121 = vmatprep.subr.msk.bf16.mxu1 %vm154_vm0, %v947_v16  ;;  %v105_v20 = vsel %vm102_vm2, %v98_v6, %v99_v7  ;;  %v106_v21 = vsel %vm102_vm2, %v101_v10, %v98_v6 }
   0x6   :  { %v104_v22 = vsel %vm102_vm2, %v99_v7, %v100_v15  ;;  %1033 = vmatprep.mubr.msk.bf16.mxu1 %vm147_vm1, %v143_v17  ;;  %v144_v23 = vpack.c.bf16 %v35_v5, %v34_v8  ;;  %vm1280_vm4 = vcmp.ne.s32.totalorder %v45_v18, 0  ;;  %v156_v26 = vsel %vm154_vm0, %v947_v16, 0 }
   0x7   :  { %v59_v25 = vand.u32 15, %v39_v19  ;;  %v38_v27 = vadd.s32 8, %v1259_v9  ;;  %v115_v28 = vsel %vm1280_vm4, %v106_v21, 0.0  ;;  %v103_v29 = vsel %vm102_vm2, %v100_v15, %v101_v10  ;;  %1032 = vmatpush3.bf16.msra.mxu1 %v156_v26 }
   0x8   :  { %v121_v30 = vrot.slane %v34_v8, 1  ;;  %v40_v31 = vadd.s32 24, %v1259_v9  ;;  %v140_v32 = vpack.c.bf16 %v105_v20, %v115_v28  ;;  %v126_v37 = vsel %vm123_vm3, %v119_v11, %v120_v12 }
   0x9   :  { %vm1291_vm5 = vcmp.ne.s32.totalorder %v59_v25, 0  ;;  %v52_v34 = vand.u32 15, %v38_v27  ;;  %v276_v40 = vsel %vm154_vm0, %v952_v13, 0  ;;  %v127_v45 = vsel %vm123_vm3, %v122_v14, %v119_v11 }
   0xa   :  { %v117_v35 = vsel %vm1291_vm5, %v104_v22, 0.0  ;;  %v125_v36 = vsel %vm123_vm3, %v120_v12, %v121_v30  ;;  %v66_v38 = vand.u32 15, %v40_v31  ;;  %1039 = vmatprep.mubr.msk.bf16.mxu0 %vm147_vm1, %v140_v32  ;;  %1034 = vmatmul.mubr.msk.bf16.vlgmr.msra.gmra.mrb[0].mxu1 %vm147_vm1, %v144_v23 }
   0xb   :  { %v141_v39 = vpack.c.bf16 %v103_v29, %v117_v35  ;;  %vm1304_vm6 = vcmp.ne.s32.totalorder %v52_v34, 15 }
   0xc   :  { %v137_v42 = vsel %vm1304_vm6, %v125_v36, 0.0  ;;  %vm1311_vm7 = vcmp.ne.s32.totalorder %v66_v38, 15 }
   0xd   :  { %1040 = vmatmul.mubr.msk.bf16.vlgmr.msra.gmra.mrb[0].mxu0 %vm147_vm1, %v141_v39  ;;  %v265_v43 = vpack.c.bf16 %v137_v42, %v126_v37 }
   0xe   :  { %1044 = vmatpush3.bf16.msra.mxu0 %v276_v40 }
   0xf   :  { %1045 = vmatprep.mubr.msk.bf16.mxu0 %vm147_vm1, %v265_v43 }
  0x10   :  { %16 = vsyncpa [#allocation5], 0  ;;  %v124_v46 = vsel %vm123_vm3, %v121_v30, %v122_v14  ;;  %v139_v47 = vsel %vm1311_vm7, %v127_v45, 0.0  ;;  %v1128_v49 = vld [vmem:[%s1486_s3 + $0x10] sm:$0xff]   ;;  %v1129_v50 = vld [vmem:[%s1486_s3 + $0x18] sm:$0xff]   ;;  %vm353_vm9 = vcmask 261120  }
  0x11   :  { %v266_v48 = vpack.c.bf16 %v139_v47, %v124_v46  ;;  %1049 = vmatprep.subr.bf16.mxu1 %v1128_v49  ;;  %v1130_v51 = vld [vmem:[%s1486_s3] sm:$0xff]   ;;  %v1131_v27 = vld [vmem:[%s1486_s3 + $0x8] sm:$0xff]   ;;  %v1134_v47 = vld [vmem:[%s1488_s5 + $0x10] sm:$0xff]   ;;  %s1188_s23 = smov [#allocation2]   ;;  %s1189_s25 = smov [#allocation4]  }
  0x12   :  { %1050 = vmatpush3.bf16.msra.mxu1 %v1128_v49  ;;  %v955_v56 = vld [vmem:[%s1485_s2] ss:$0 sm:$0xff]  ;;  %v1133_v46 = vld [vmem:[%s1486_s3 + $0x28] sm:$0xff]   ;;  %1073 = vmatprep.subr.bf16.mxu0 %v1134_v47  ;;  %s916_s24 = sshll.u32 %s1188_s23, 4  ;;  %s928_s26 = sshll.u32 %s1189_s25, 4  ;;  %s917_s24 = int_to_ptr.vmem [resolvable:$true] %s916_s24  ;;  %s1433_s26 = int_to_ptr.vmem [resolvable:$true] %s928_s26 }
  0x13   :  { %1051 = vmatprep.subr.bf16.mxu1 %v1129_v50  ;;  %v1132_v45 = vld [vmem:[%s1486_s3 + $0x20] sm:$0xff]   ;;  %v1139_v9 = vld [vmem:[%s1488_s5 + $0x28] sm:$0xff]   ;;  %s1140_s27 = scalar_lea.vmem %s917_s24, 512  ;;  %p1145_p1 = scmp.lt.s32.totalorder %s917_s24, %s917_s24 }
  0x14   :  { %v1136_v49 = vld [vmem:[%s1488_s5] sm:$0xff]   ;;  %p1141_p0 = scmp.ne.s32.totalorder %s917_s24, %s1140_s27  ;;  %p1146_p2 = scmp.lt.s32.totalorder %s1140_s27, %s1140_s27 }
  0x16   :  { %1052 = vmatpush3.bf16.msra.mxu1 %v1129_v50  ;;  %v976_v50 = vld [vmem:[%s1487_s4] ss:$0 sm:$0xff]  ;;  %p1147_p3 = por %p1146_p2, %p1145_p1 }
  0x17   :  { %1057 = vmatprep.subr.bf16.mxu1 %v1130_v51 }
  0x18   :  { %p1148_p4 = pnand %p1147_p3, %p1141_p0 }
  0x19   :  { %1046 = vmatmul.mubr.msk.bf16.vlgmr.msra.gmra.mrb[0].mxu0 %vm147_vm1, %v266_v48  ;;  %v1135_v48 = vld [vmem:[%s1488_s5 + $0x18] sm:$0xff]  }
  0x1a   :  { %1074 = vmatpush3.bf16.msra.mxu0 %v1134_v47 }
  0x1b   :  { %1075 = vmatprep.subr.bf16.mxu0 %v1135_v48 }
  0x1e   :  { %1076 = vmatpush3.bf16.msra.mxu0 %v1135_v48 }
  0x1f   :  { %1081 = vmatprep.subr.bf16.mxu0 %v1136_v49 }
  0xdd   :  { %v1035_v52 = vpop.f32.mrb[0].mxu1 }
  0xde   :  { %v192_v53 = vpop.f32.mrb[1].mxu1 }
  0xdf   :  { %v1036_v54 = vpop.f32.mrb[2].mxu1 }
  0xe0   :  { %v195_v55 = vpop.f32.mrb[3].mxu1 }
  0xec   :  { %v1047_v57 = vpop.f32.mrb[0].mxu0 }
  0xed   :  { %v1097_v58 = vadd.f32 %v1047_v57, %v1035_v52  ;;  %v312_v59 = vpop.f32.mrb[1].mxu0 }
  0xee   :  { %v1098_v60 = vadd.f32 %v312_v59, %v192_v53  ;;  %v1048_v61 = vpop.f32.mrb[2].mxu0 }
  0xef   :  { %v339_v62 = vadd.f32 %v1097_v58, %v955_v56  ;;  %v1099_v63 = vadd.f32 %v1048_v61, %v1036_v54  ;;  %v315_v0 = vpop.f32.mrb[3].mxu0 }
  0xf0   :  { %v337_v1 = vadd.f32 %v1098_v60, %v955_v56  ;;  %v1100_v2 = vadd.f32 %v315_v0, %v195_v55 }
  0xf1   :  { %vm343_vm8 = vcmp.gt.f32.partialorder %v339_v62, 0.0  ;;  %v347_v3 = vmul.f32 0.2, %v339_v62  ;;  %v340_v4 = vadd.f32 %v1099_v63, %v955_v56 }
  0xf2   :  { %vm341_vm10 = vcmp.gt.f32.partialorder %v337_v1, 0.0  ;;  %v345_v5 = vmul.f32 0.2, %v337_v1  ;;  %v338_v6 = vadd.f32 %v1100_v2, %v955_v56 }
  0xf3   :  { %v351_v7 = vsel %vm343_vm8, %v339_v62, %v347_v3  ;;  %vm344_vm11 = vcmp.gt.f32.partialorder %v340_v4, 0.0  ;;  %v348_v8 = vmul.f32 0.2, %v340_v4 }
  0xf4   :  { %356 = vst.msk [vmem:[#allocation2 + $0x10] sm:$0xff] %vm353_vm9, %v351_v7  ;;  %v349_v10 = vsel %vm341_vm10, %v337_v1, %v345_v5  ;;  %vm342_vm12 = vcmp.gt.f32.partialorder %v338_v6, 0.0  ;;  %v346_v14 = vmul.f32 0.2, %v338_v6  ;;  %v361_v18 = vrot.slane %v351_v7, 7 }
  0xf5   :  { %354 = vst.msk [vmem:[#allocation2] sm:$0xff] %vm353_vm9, %v349_v10  ;;  %v359_v11 = vrot.slane %v349_v10, 7  ;;  %v371_v12 = vrot.slane %v349_v10, 1  ;;  %v352_v13 = vsel %vm344_vm11, %v340_v4, %v348_v8  ;;  %v373_v19 = vrot.slane %v351_v7, 1 }
  0xf6   :  { %357 = vst.msk [vmem:[#allocation2 + $0x18] sm:$0xff] %vm353_vm9, %v352_v13  ;;  %v362_v15 = vrot.slane %v352_v13, 7  ;;  %v374_v16 = vrot.slane %v352_v13, 1  ;;  %v390_v17 = vpack.c.bf16 %v352_v13, %v351_v7  ;;  %v350_v20 = vsel %vm342_vm12, %v338_v6, %v346_v14 }
  0xf7   :  { %355 = vst.msk [vmem:[#allocation2 + $0x8] sm:$0xff] %vm353_vm9, %v350_v20  ;;  %v360_v21 = vrot.slane %v350_v20, 7  ;;  %v372_v22 = vrot.slane %v350_v20, 1  ;;  %v389_v23 = vpack.c.bf16 %v350_v20, %v349_v10 }
  0xf8   :  { %v366_v25 = vsel %vm102_vm2, %v362_v15, %v359_v11  ;;  %v363_v28 = vsel %vm102_vm2, %v361_v18, %v362_v15  ;;  %v375_v29 = vsel %vm123_vm3, %v373_v19, %v374_v16  ;;  %v378_v30 = vsel %vm123_vm3, %v374_v16, %v371_v12  ;;  %v1137_v16 = vld [vmem:[%s1488_s5 + $0x8] sm:$0xff]  }
  0xf9   :  { %v367_v26 = vsel %vm1280_vm4, %v366_v25, 0.0  ;;  %1053 = vmatprep.mubr.msk.bf16.mxu1 %vm353_vm9, %v389_v23  ;;  %v365_v31 = vsel %vm102_vm2, %v359_v11, %v360_v21  ;;  %v364_v32 = vsel %vm102_vm2, %v360_v21, %v361_v18  ;;  %v376_v34 = vsel %vm123_vm3, %v372_v22, %v373_v19 }
  0xfa   :  { %v377_v35 = vsel %vm123_vm3, %v371_v12, %v372_v22  ;;  %1054 = vmatmul.mubr.msk.bf16.vlgmr.msra.gmra.mrb[4].mxu1 %vm353_vm9, %v390_v17  ;;  %v383_v36 = vpack.c.bf16 %v365_v31, %v367_v26  ;;  %v369_v37 = vsel %vm1291_vm5, %v364_v32, 0.0  ;;  %v380_v38 = vsel %vm1304_vm6, %v376_v34, 0.0 }
  0xfb   :  { %v382_v39 = vsel %vm1311_vm7, %v378_v30, 0.0  ;;  %1058 = vmatpush3.bf16.msra.mxu1 %v1130_v51  ;;  %v384_v40 = vpack.c.bf16 %v363_v28, %v369_v37  ;;  %v530_v42 = vpack.c.bf16 %v380_v38, %v377_v35  ;;  %v1138_v30 = vld [vmem:[%s1488_s5 + $0x20] sm:$0xff]  }
  0xfc   :  { %v531_v43 = vpack.c.bf16 %v382_v39, %v375_v29  ;;  %1061 = vmatprep.mubr.msk.bf16.mxu1 %vm353_vm9, %v383_v36  ;;  %1059 = vmatprep.subr.bf16.mxu1 %v1131_v27 }
  0xff   :  { %1060 = vmatpush3.bf16.msra.mxu1 %v1131_v27 }
 0x100   :  { %1065 = vmatprep.subr.bf16.mxu1 %v1132_v45 }
 0x106   :  { %1062 = vmatmul.mubr.msk.bf16.vlgmr.msra.gmra.mrb[4].mxu1 %vm353_vm9, %v384_v40 }
 0x107   :  { %1066 = vmatpush3.bf16.msra.mxu1 %v1132_v45  ;;  %1069 = vmatprep.mubr.msk.bf16.mxu1 %vm353_vm9, %v530_v42 }
 0x108   :  { %1067 = vmatprep.subr.bf16.mxu1 %v1133_v46 }
 0x10b   :  { %1068 = vmatpush3.bf16.msra.mxu1 %v1133_v46 }
 0x112   :  { %1070 = vmatmul.mubr.msk.bf16.vlgmr.msra.gmra.mrb[4].mxu1 %vm353_vm9, %v531_v43 }
 0x1e5   :  { %v1071_v51 = vpop.f32.mrb[4].mxu1 }
 0x1e6   :  { %v616_v52 = vadd.f32 %v1071_v51, %v976_v50  ;;  %v589_v53 = vpop.f32.mrb[5].mxu1 }
 0x1e7   :  { %v614_v54 = vadd.f32 %v976_v50, %v589_v53  ;;  %v1072_v55 = vpop.f32.mrb[6].mxu1 }
 0x1e8   :  { %vm620_vm13 = vcmp.gt.f32.partialorder %v616_v52, 0.0  ;;  %v624_v56 = vmul.f32 0.2, %v616_v52  ;;  %v617_v57 = vadd.f32 %v1072_v55, %v976_v50  ;;  %v592_v58 = vpop.f32.mrb[7].mxu1 }
 0x1e9   :  { %vm618_vm14 = vcmp.gt.f32.partialorder %v614_v54, 0.0  ;;  %v622_v59 = vmul.f32 0.2, %v614_v54  ;;  %v615_v60 = vadd.f32 %v976_v50, %v592_v58 }
 0x1ea   :  { %v628_v61 = vsel %vm620_vm13, %v616_v52, %v624_v56  ;;  %vm621_vm15 = vcmp.gt.f32.partialorder %v617_v57, 0.0  ;;  %v625_v62 = vmul.f32 0.2, %v617_v57 }
 0x1eb   :  { %632 = vst.msk [vmem:[#allocation4 + $0x10] sm:$0xff] %vm353_vm9, %v628_v61  ;;  %v626_v63 = vsel %vm618_vm14, %v614_v54, %v622_v59  ;;  %vm619_vm0 = vcmp.gt.f32.partialorder %v615_v60, 0.0  ;;  %v623_v3 = vmul.f32 0.2, %v615_v60  ;;  %v637_v7 = vrot.slane %v628_v61, 7 }
 0x1ec   :  { %630 = vst.msk [vmem:[#allocation4] sm:$0xff] %vm353_vm9, %v626_v63  ;;  %v635_v0 = vrot.slane %v626_v63, 7  ;;  %v647_v1 = vrot.slane %v626_v63, 1  ;;  %v629_v2 = vsel %vm621_vm15, %v617_v57, %v625_v62  ;;  %v649_v8 = vrot.slane %v628_v61, 1 }
 0x1ed   :  { %633 = vst.msk [vmem:[#allocation4 + $0x18] sm:$0xff] %vm353_vm9, %v629_v2  ;;  %v638_v4 = vrot.slane %v629_v2, 7  ;;  %v650_v5 = vrot.slane %v629_v2, 1  ;;  %v666_v6 = vpack.c.bf16 %v629_v2, %v628_v61  ;;  %v627_v10 = vsel %vm619_vm0, %v615_v60, %v623_v3 }
 0x1ee   :  { %631 = vst.msk [vmem:[#allocation4 + $0x8] sm:$0xff] %vm353_vm9, %v627_v10  ;;  %v636_v12 = vrot.slane %v627_v10, 7  ;;  %v648_v13 = vrot.slane %v627_v10, 1  ;;  %v665_v14 = vpack.c.bf16 %v627_v10, %v626_v63 }
 0x1ef   :  { %v654_v11 = vsel %vm123_vm3, %v650_v5, %v647_v1  ;;  %v642_v15 = vsel %vm102_vm2, %v638_v4, %v635_v0  ;;  %v639_v17 = vsel %vm102_vm2, %v637_v7, %v638_v4  ;;  %v651_v18 = vsel %vm123_vm3, %v649_v8, %v650_v5 }
 0x1f0   :  { %v658_v19 = vsel %vm1311_vm7, %v654_v11, 0.0  ;;  %v640_v20 = vsel %vm102_vm2, %v636_v12, %v637_v7  ;;  %1077 = vmatprep.mubr.msk.bf16.mxu0 %vm353_vm9, %v665_v14  ;;  %v641_v21 = vsel %vm102_vm2, %v635_v0, %v636_v12  ;;  %v643_v22 = vsel %vm1280_vm4, %v642_v15, 0.0 }
 0x1f1   :  { %v652_v23 = vsel %vm123_vm3, %v648_v13, %v649_v8  ;;  %1078 = vmatmul.mubr.msk.bf16.vlgmr.msra.gmra.mrb[4].mxu0 %vm353_vm9, %v666_v6  ;;  %v659_v25 = vpack.c.bf16 %v641_v21, %v643_v22  ;;  %v645_v44 = vsel %vm1291_vm5, %v640_v20, 0.0  ;;  %v653_v26 = vsel %vm123_vm3, %v647_v1, %v648_v13 }
 0x1f2   :  { %v656_v27 = vsel %vm1304_vm6, %v652_v23, 0.0  ;;  %1082 = vmatpush3.bf16.msra.mxu0 %v1136_v49  ;;  %v660_v28 = vpack.c.bf16 %v639_v17, %v645_v44  ;;  %v807_v24 = vpack.c.bf16 %v658_v19, %v651_v18 }
 0x1f3   :  { %v806_v29 = vpack.c.bf16 %v656_v27, %v653_v26  ;;  %1085 = vmatprep.mubr.msk.bf16.mxu0 %vm353_vm9, %v659_v25  ;;  %1083 = vmatprep.subr.bf16.mxu0 %v1137_v16 }
 0x1f6   :  { %1084 = vmatpush3.bf16.msra.mxu0 %v1137_v16 }
 0x1f7   :  { %1089 = vmatprep.subr.bf16.mxu0 %v1138_v30 }
 0x1fd   :  { %1086 = vmatmul.mubr.msk.bf16.vlgmr.msra.gmra.mrb[4].mxu0 %vm353_vm9, %v660_v28 }
 0x1fe   :  { %1090 = vmatpush3.bf16.msra.mxu0 %v1138_v30  ;;  %1093 = vmatprep.mubr.msk.bf16.mxu0 %vm353_vm9, %v806_v29 }
 0x1ff   :  { %1091 = vmatprep.subr.bf16.mxu0 %v1139_v9 }
 0x202   :  { %1092 = vmatpush3.bf16.msra.mxu0 %v1139_v9 }
 0x209   :  { %1094 = vmatmul.mubr.msk.bf16.vlgmr.msra.gmra.mrb[4].mxu0 %vm353_vm9, %v807_v24 }
 0x20a   :  { %1151 = shalt.err (!%p1148_p4)
}
 0x20b   :  { %s1152_s2 = scalar_lea.hbm %s1490_s7, 512 }
 0x20c   :  { %p1153_p5 = scmp.ne.s32.totalorder %s1490_s7, %s1152_s2  ;;  %p1156_p6 = scmp.lt.u32.totalorder %s1152_s2, %s1490_s7 }
 0x20e   :  { %p1158_p7 = pnand %p1156_p6, %p1153_p5 }
 0x210   :  { %1161 = shalt.err (!%p1158_p7)
}
 0x211   :  { %s1190_s12 = smov 128   ;;  %s1191_s13 = smov 8  }
 0x212   :  { %922 = dma.vmem_to_hbm [thread:$0]  %s917_s24, 512, %s1490_s7, [#allocation3], %s1190_s12, %s1190_s12, %s1191_s13  }
 0x213   :  { %s1162_s16 = scalar_lea.vmem %s1433_s26, 512  ;;  %p1167_p9 = scmp.lt.s32.totalorder %s1433_s26, %s1433_s26 }
 0x214   :  { %p1163_p8 = scmp.ne.s32.totalorder %s1433_s26, %s1162_s16  ;;  %p1168_p10 = scmp.lt.s32.totalorder %s1162_s16, %s1162_s16 }
 0x216   :  { %p1169_p11 = por %p1168_p10, %p1167_p9 }
 0x218   :  { %p1170_p12 = pnand %p1169_p11, %p1163_p8 }
 0x21a   :  { %1173 = shalt.err (!%p1170_p12)
}
 0x21b   :  { %s1174_s18 = scalar_lea.hbm %s1491_s8, 512 }
 0x21c   :  { %p1175_p13 = scmp.ne.s32.totalorder %s1491_s8, %s1174_s18  ;;  %p1178_p0 = scmp.lt.u32.totalorder %s1174_s18, %s1491_s8 }
 0x21e   :  { %p1180_p1 = pnand %p1178_p0, %p1175_p13 }
 0x220   :  { %1183 = shalt.err (!%p1180_p1)
}
 0x221   :  { %934 = dma.vmem_to_hbm [thread:$0]  %s1433_s26, 512, %s1491_s8, [#allocation5], %s1190_s12, %s1190_s12, %s1191_s13   ;;  %vm906_vm2 = vcmask 64512  }
 0x222   :  { %v997_v33 = vld [vmem:[%s1489_s6] ss:$0 sm:$0xff] }
 0x2dc   :  { %v1095_v41 = vpop.f32.mrb[4].mxu0 }
 0x2dd   :  { %v892_v31 = vadd.f32 %v1095_v41, %v997_v33  ;;  %v865_v32 = vpop.f32.mrb[5].mxu0 }
 0x2de   :  { %v890_v34 = vadd.f32 %v997_v33, %v865_v32  ;;  %v1096_v35 = vpop.f32.mrb[6].mxu0 }
 0x2df   :  { %vm896_vm1 = vcmp.gt.f32.partialorder %v892_v31, 0.0  ;;  %v900_v36 = vmul.f32 0.2, %v892_v31  ;;  %v893_v37 = vadd.f32 %v1096_v35, %v997_v33  ;;  %v868_v38 = vpop.f32.mrb[7].mxu0 }
 0x2e0   :  { %vm894_vm3 = vcmp.gt.f32.partialorder %v890_v34, 0.0  ;;  %v898_v39 = vmul.f32 0.2, %v890_v34  ;;  %v891_v40 = vadd.f32 %v997_v33, %v868_v38 }
 0x2e1   :  { %v904_v42 = vsel %vm896_vm1, %v892_v31, %v900_v36  ;;  %vm897_vm4 = vcmp.gt.f32.partialorder %v893_v37, 0.0  ;;  %v901_v43 = vmul.f32 0.2, %v893_v37 }
 0x2e2   :  { %909 = vst.msk [vmem:[%s1492_s9 + $0x10] sm:$0xff] %vm906_vm2, %v904_v42  ;;  %v902_v45 = vsel %vm894_vm3, %v890_v34, %v898_v39  ;;  %vm895_vm5 = vcmp.gt.f32.partialorder %v891_v40, 0.0  ;;  %v899_v46 = vmul.f32 0.2, %v891_v40 }
 0x2e3   :  { %907 = vst.msk [vmem:[%s1492_s9] sm:$0xff] %vm906_vm2, %v902_v45  ;;  %v905_v47 = vsel %vm897_vm4, %v893_v37, %v901_v43 }
 0x2e4   :  { %910 = vst.msk [vmem:[%s1492_s9 + $0x18] sm:$0xff] %vm906_vm2, %v905_v47  ;;  %v903_v48 = vsel %vm895_vm5, %v891_v40, %v899_v46 }
 0x2e5   :  { %908 = vst.msk [vmem:[%s1492_s9 + $0x8] sm:$0xff] %vm906_vm2, %v903_v48 }
 0x2e6   :  { %1184 = dma.done.wait [#allocation3], 512  }
 0x2e7   :  { %1185 = vsyncadd [#allocation3], 4294966784 }
 0x2e8   :  { %1186 = dma.done.wait [#allocation5], 512  }
 0x2e9   :  { %1187 = vsyncadd [#allocation5], 4294966784 }
 0x2ea   :  { %945 = vsyncpa [#allocation3], 1 }
 0x2eb   :  { %946 = vsyncpa [#allocation5], 1 }

</bundles_post_ra>
